<compile_context>
chip_gen: v7x
topology: tpu7x:2x2x1
jax: 0.10.0
libtpu: 0.0.40
codegen_flags: <defaults>
</compile_context>

<pallas_src>
import functools
import math

import jax
import jax.numpy as jnp
from jax import lax
from jax.experimental import pallas as pl
from jax.experimental.pallas import tpu as pltpu


def _round_up(n, m):
    return ((n + m - 1) // m) * m


def _act(h, activation):
    if activation == "relu":
        return jnp.maximum(h, 0.0)
    if activation == "gelu":
        return jax.nn.gelu(h, approximate=True)
    raise NotImplementedError(f"activation {activation!r} not supported")


def _layer_norm(v, gamma, beta, eps):
    mu = jnp.mean(v, axis=-1, keepdims=True)
    vc = v - mu
    var = jnp.mean(vc * vc, axis=-1, keepdims=True)
    return vc * lax.rsqrt(var + eps) * gamma + beta


def _ffn_kernel(x_ref, w1_ref, b1_ref, w2_ref, b2_ref, g_ref, be_ref,
                o_ref, *scratch, activation, normalize_before, eps,
                mxu_dtype, single_k, store_xin):
    """One (tm, d_model) token tile x one (tk) slice of dim_feedforward.

    grid = (num_token_blocks, nk); axis 1 is the reduction over
    dim_feedforward with linear2 partial sums held in a VMEM f32 accumulator
    (skipped entirely when nk == 1).
    """
    idx = 0
    acc_ref = None
    xin_ref = None
    if not single_k:
        acc_ref = scratch[idx]
        idx += 1
    if store_xin:
        xin_ref = scratch[idx]
        idx += 1

    if single_k:
        k, nk = 0, 1
    else:
        k = pl.program_id(1)
        nk = pl.num_programs(1)

    def make_xin():
        x = x_ref[...].astype(jnp.float32)
        if normalize_before:
            g = g_ref[...].astype(jnp.float32)
            be = be_ref[...].astype(jnp.float32)
            xin = _layer_norm(x, g, be, eps)
        else:
            xin = x
        return xin.astype(mxu_dtype)

    if store_xin:
        # Hoist the pre-norm LayerNorm out of the reduction loop: computed
        # once per token block (k == 0), reused for every dff slice.
        @pl.when(k == 0)
        def _():
            xin_ref[...] = make_xin()
        xin = xin_ref[...]
    else:
        xin = make_xin()

    # linear1 slice + bias + activation  -> (tm, tk)
    h = jnp.dot(xin, w1_ref[...], preferred_element_type=jnp.float32)
    h = _act(h + b1_ref[...].astype(jnp.float32), activation).astype(mxu_dtype)
    # partial linear2                    -> (tm, d_model), f32 accumulation
    part = jnp.dot(h, w2_ref[...], preferred_element_type=jnp.float32)

    def finalize(y):
        x = x_ref[...].astype(jnp.float32)
        y = y + b2_ref[...].astype(jnp.float32)
        if normalize_before:
            out = x + y
        else:
            g = g_ref[...].astype(jnp.float32)
            be = be_ref[...].astype(jnp.float32)
            out = _layer_norm(x + y, g, be, eps)
        o_ref[...] = out.astype(o_ref.dtype)

    if single_k:
        finalize(part)
    else:
        # Skip the explicit zero-fill: first partial is a plain store.
        @pl.when(k == 0)
        def _():
            acc_ref[...] = part

        @pl.when(k > 0)
        def _():
            acc_ref[...] += part

        @pl.when(k == nk - 1)
        def _():
            finalize(acc_ref[...])


def _vmem_capacity_bytes():
    try:
        info = pltpu.get_tpu_info()
        cap = int(getattr(info, "vmem_capacity_bytes", 64 << 20))
        return cap if cap > 0 else (64 << 20)
    except Exception:
        return 64 << 20


def ffn_layer(x, w1, b1, w2, b2, gamma, beta, *, activation="relu",
              normalize_before=False, eps=1e-5, block_m=512, block_k=None,
              mxu_dtype=None, vmem_limit_bytes=None):
    """JAX/Pallas equivalent of FFNLayer.forward(tgt) (dropout = 0).

    x:      (..., d_model)
    w1:     (d_model, dim_feedforward)   b1: (dim_feedforward,)
    w2:     (dim_feedforward, d_model)   b2: (d_model,)
    gamma, beta: (d_model,)   LayerNorm affine params.
    mxu_dtype: dtype fed to the MXU (default: bf16 iff x is bf16, else f32);
               LayerNorm / bias / accumulation always stay in f32.
    """
    d_model, dff = w1.shape
    assert w2.shape == (dff, d_model)
    orig_shape = x.shape
    assert orig_shape[-1] == d_model

    if mxu_dtype is None:
        mxu_dtype = jnp.bfloat16 if x.dtype == jnp.bfloat16 else jnp.float32
    mxu_dtype = jnp.dtype(mxu_dtype)

    xt = x.reshape(-1, d_model)
    n = xt.shape[0]

    # ---- VMEM budgeting (128 MiB on v5e/v6e, 64 MiB per-core on v7x) -------
    cap = _vmem_capacity_bytes()
    if vmem_limit_bytes is None:
        vmem_limit_bytes = max(32 << 20, min(int(0.85 * cap), 100 << 20))
    budget = int(0.70 * vmem_limit_bytes)

    w_bytes = mxu_dtype.itemsize
    x_bytes = jnp.dtype(x.dtype).itemsize
    o_bytes = x_bytes

    force_tiled = block_k is not None and dff > block_k
    if block_k is None:
        block_k = 1024
    block_k = max(128, _round_up(block_k, 128))

    # Token block (parallel axis): big to amortize weight streaming.
    tm = min(block_m, _round_up(n, 8))

    def ws(tm_, tk_, nk_):
        s = 2 * tm_ * d_model * x_bytes                       # x (double-buffered)
        s += 2 * tm_ * d_model * o_bytes                      # out
        s += 2 * (d_model * tk_ + tk_ * d_model) * w_bytes    # w1 + w2 tiles
        s += 2 * (tk_ + 3 * d_model) * 4                      # biases, gamma, beta
        if nk_ > 1:
            s += tm_ * d_model * 4                            # f32 accumulator
            if normalize_before:
                s += tm_ * d_model * w_bytes                  # hoisted xin
        return s

    if not force_tiled and ws(tm, dff, 1) <= budget:
        # Resident-weight regime: whole W1/W2 live in VMEM for the whole grid.
        tk, dff_p = dff, dff
    else:
        tk = min(block_k, _round_up(dff, 128))
        while tk > 128 and ws(tm, tk, 2) > budget:
            tk //= 2
        while tm > 8 and ws(tm, tk, 2) > budget:
            tm = _round_up(tm // 2, 8)
        dff_p = _round_up(dff, tk)
    nk = dff_p // tk

    # v7x has two TensorCores: keep >= 2 token blocks on the parallel axis.
    if n > 8 and _round_up(n, tm) // tm < 2:
        tm = _round_up((n + 1) // 2, 8)
    np_ = _round_up(n, tm)
    if np_ != n:
        xt = jnp.pad(xt, ((0, np_ - n), (0, 0)))

    # Zero-pad dim_feedforward so it tiles evenly; padded columns contribute
    # nothing (act(0) == 0 for relu/gelu, padded W2 rows are zero).
    if dff_p != dff:
        w1 = jnp.pad(w1, ((0, 0), (0, dff_p - dff)))
        b1 = jnp.pad(b1, ((0, dff_p - dff),))
        w2 = jnp.pad(w2, ((0, dff_p - dff), (0, 0)))

    w1 = w1.astype(mxu_dtype)
    w2 = w2.astype(mxu_dtype)
    b1 = b1.astype(jnp.float32).reshape(1, dff_p)
    b2 = b2.astype(jnp.float32).reshape(1, d_model)
    gamma = gamma.astype(jnp.float32).reshape(1, d_model)
    beta = beta.astype(jnp.float32).reshape(1, d_model)

    single_k = nk == 1
    store_xin = normalize_before and not single_k

    kernel = functools.partial(
        _ffn_kernel, activation=activation, normalize_before=normalize_before,
        eps=eps, mxu_dtype=mxu_dtype, single_k=single_k, store_xin=store_xin)

    scratch_shapes = []
    if not single_k:
        scratch_shapes.append(pltpu.VMEM((tm, d_model), jnp.float32))
    if store_xin:
        scratch_shapes.append(pltpu.VMEM((tm, d_model), mxu_dtype))

    def build(weight_pipeline_mode):
        wk = {}
        if weight_pipeline_mode is not None:
            wk = dict(pipeline_mode=weight_pipeline_mode)
        return pl.pallas_call(
            kernel,
            out_shape=jax.ShapeDtypeStruct((np_, d_model), x.dtype),
            grid_spec=pltpu.PrefetchScalarGridSpec(
                num_scalar_prefetch=0,
                grid=(np_ // tm, nk),
                in_specs=[
                    pl.BlockSpec((tm, d_model), lambda i, k: (i, 0)),        # x
                    pl.BlockSpec((d_model, tk), lambda i, k: (0, k), **wk),  # w1
                    pl.BlockSpec((1, tk), lambda i, k: (0, k)),              # b1
                    pl.BlockSpec((tk, d_model), lambda i, k: (k, 0), **wk),  # w2
                    pl.BlockSpec((1, d_model), lambda i, k: (0, 0)),         # b2
                    pl.BlockSpec((1, d_model), lambda i, k: (0, 0)),         # gamma
                    pl.BlockSpec((1, d_model), lambda i, k: (0, 0)),         # beta
                ],
                out_specs=pl.BlockSpec((tm, d_model), lambda i, k: (i, 0)),
                scratch_shapes=scratch_shapes,
            ),
            compiler_params=pltpu.CompilerParams(
                dimension_semantics=("parallel", "arbitrary"),
                vmem_limit_bytes=int(vmem_limit_bytes)),
        )

    args = (xt, w1, b1, w2, b2, gamma, beta)
    if single_k:
        # Constant weight index_maps -> W1/W2 DMA'd once for the whole kernel;
        # Buffered(1) drops the redundant second weight buffer. Fall back to
        # the default pipelining if the runtime rejects single-buffering.
        try:
            out = jax.block_until_ready(build(pl.Buffered(1))(*args))
        except Exception:
            out = build(None)(*args)
    else:
        out = build(None)(*args)

    if np_ != n:
        out = out[:n]
    return out.reshape(orig_shape)


def _reference(x, w1, b1, w2, b2, gamma, beta, activation="relu",
               normalize_before=False, eps=1e-5):
    """Pure-JAX transcription of FFNLayer.forward (dropout = 0) for checking."""
    hp = jax.lax.Precision.HIGHEST

    def layer_norm(v):
        mu = jnp.mean(v, axis=-1, keepdims=True)
        vc = v - mu
        var = jnp.mean(vc * vc, axis=-1, keepdims=True)
        return vc * lax.rsqrt(var + eps) * gamma + beta

    def mlp(v):
        h = _act(jnp.dot(v, w1, precision=hp) + b1, activation)
        return jnp.dot(h, w2, precision=hp) + b2

    if normalize_before:
        return x + mlp(layer_norm(x))
    return layer_norm(x + mlp(x))


if __name__ == "__main__":
    key = jax.random.PRNGKey(0)

    def xavier(k, fan_in, fan_out):
        lim = math.sqrt(6.0 / (fan_in + fan_out))
        return jax.random.uniform(k, (fan_in, fan_out), jnp.float32, -lim, lim)

    def make_params(k, d_model, dff):
        ks = jax.random.split(k, 6)
        w1 = xavier(ks[0], d_model, dff)
        b1 = jax.random.uniform(ks[1], (dff,), jnp.float32, -0.1, 0.1)
        w2 = xavier(ks[2], dff, d_model)
        b2 = jax.random.uniform(ks[3], (d_model,), jnp.float32, -0.1, 0.1)
        gamma = 1.0 + 0.05 * jax.random.normal(ks[4], (d_model,), jnp.float32)
        beta = 0.05 * jax.random.normal(ks[5], (d_model,), jnp.float32)
        return w1, b1, w2, b2, gamma, beta

    ok = True

    # Config 1: module-like tiny shapes, resident-weight path (nk == 1), f32.
    seq_len, batch, d_model, dff = 8, 2, 32, 64
    k0, k1 = jax.random.split(key)
    x = jax.random.normal(k0, (seq_len, batch, d_model), jnp.float32)
    params = make_params(k1, d_model, dff)
    for normalize_before in (False, True):
        for activation in ("relu", "gelu"):
            out = jax.block_until_ready(
                ffn_layer(x, *params, activation=activation,
                          normalize_before=normalize_before))
            ref = _reference(x, *params, activation=activation,
                             normalize_before=normalize_before)
            ok = ok and out.shape == x.shape and out.dtype == jnp.float32
            ok = ok and bool(jnp.allclose(out, ref, atol=5e-3, rtol=5e-3))

    # Config 1b: bf16 MXU data path (bf16 inputs/weights, f32 LN + accumulate).
    xb = x.astype(jnp.bfloat16)
    pb = tuple(p.astype(jnp.bfloat16) for p in params)
    out = jax.block_until_ready(
        ffn_layer(xb, *pb, activation="relu", normalize_before=False))
    ref = _reference(x, *params, activation="relu", normalize_before=False)
    ok = ok and out.dtype == jnp.bfloat16
    ok = ok and bool(jnp.allclose(out.astype(jnp.float32), ref,
                                  atol=1e-1, rtol=1e-1))

    # Config 2: force the tiled-reduction path (nk > 1) with a dff that is not
    # a multiple of the tile (zero-padded), exercising the f32 accumulator and
    # the hoisted pre-norm scratch.
    seq_len, batch, d_model, dff = 8, 2, 128, 320
    k2, k3 = jax.random.split(k1)
    x2 = jax.random.normal(k2, (seq_len, batch, d_model), jnp.float32)
    params2 = make_params(k3, d_model, dff)
    for normalize_before in (False, True):
        out = jax.block_until_ready(
            ffn_layer(x2, *params2, activation="relu",
                      normalize_before=normalize_before, block_k=128))
        ref = _reference(x2, *params2, activation="relu",
                         normalize_before=normalize_before)
        ok = ok and bool(jnp.allclose(out, ref, atol=5e-3, rtol=5e-3))

    if ok:
        print("KERNEL_OK")
</pallas_src>

<mosaic_0001>
module attributes {stable_mosaic.version = 11 : i64} {
  func.func @_ffn_kernel(%arg0: i32, %arg1: i32, %arg2: memref<8x32xf32, #tpu.memory_space<vmem>>, %arg3: memref<32x64xf32, #tpu.memory_space<vmem>>, %arg4: memref<1x64xf32, #tpu.memory_space<vmem>>, %arg5: memref<64x32xf32, #tpu.memory_space<vmem>>, %arg6: memref<1x32xf32, #tpu.memory_space<vmem>>, %arg7: memref<1x32xf32, #tpu.memory_space<vmem>>, %arg8: memref<1x32xf32, #tpu.memory_space<vmem>>, %arg9: memref<8x32xf32, #tpu.memory_space<vmem>>) attributes {dimension_semantics = [#tpu.dimension_semantics<parallel>, #tpu.dimension_semantics<arbitrary>], iteration_bounds = array<i64: 2, 1>, scalar_prefetch = 0 : i64, scratch_operands = 0 : i64, tpu.core_type = #tpu.core_type<tc>, window_params = [{transform_indices = @transform_0, window_bounds = array<i64: 8, 32>}, {pipeline_mode = #tpu.pipeline_mode<synchronous>, transform_indices = @transform_1, window_bounds = array<i64: 32, 64>}, {transform_indices = @transform_2, window_bounds = array<i64: 1, 64>}, {pipeline_mode = #tpu.pipeline_mode<synchronous>, transform_indices = @transform_3, window_bounds = array<i64: 64, 32>}, {pipeline_mode = #tpu.pipeline_mode<synchronous>, transform_indices = @transform_4, window_bounds = array<i64: 1, 32>}, {pipeline_mode = #tpu.pipeline_mode<synchronous>, transform_indices = @transform_5, window_bounds = array<i64: 1, 32>}, {pipeline_mode = #tpu.pipeline_mode<synchronous>, transform_indices = @transform_6, window_bounds = array<i64: 1, 32>}, {transform_indices = @transform_7, window_bounds = array<i64: 8, 32>}]} {
    %c0 = arith.constant 0 : index
    %c0_0 = arith.constant 0 : index
    %0 = vector.load %arg2[%c0, %c0_0] : memref<8x32xf32, #tpu.memory_space<vmem>>, vector<8x32xf32>
    %c0_1 = arith.constant 0 : index
    %c0_2 = arith.constant 0 : index
    %1 = vector.load %arg3[%c0_1, %c0_2] : memref<32x64xf32, #tpu.memory_space<vmem>>, vector<32x64xf32>
    %cst = arith.constant dense<0.000000e+00> : vector<8x64xf32>
    %2 = tpu.matmul %0, %1, %cst {dimension_numbers = #tpu.dot_dimension_numbers<[1], [0], [0], [1], [0, 0, 1, 1], [], []>} : vector<8x32xf32>, vector<32x64xf32>, vector<8x64xf32> -> vector<8x64xf32>
    %c0_3 = arith.constant 0 : index
    %c0_4 = arith.constant 0 : index
    %3 = vector.load %arg4[%c0_3, %c0_4] : memref<1x64xf32, #tpu.memory_space<vmem>>, vector<1x64xf32>
    %4 = vector.broadcast %3 : vector<1x64xf32> to vector<8x64xf32>
    %5 = arith.addf %2, %4 : vector<8x64xf32>
    %cst_5 = arith.constant 0.000000e+00 : f32
    %6 = vector.broadcast %cst_5 : f32 to vector<8x64xf32>
    %7 = arith.maximumf %5, %6 : vector<8x64xf32>
    %c0_6 = arith.constant 0 : index
    %c0_7 = arith.constant 0 : index
    %8 = vector.load %arg5[%c0_6, %c0_7] : memref<64x32xf32, #tpu.memory_space<vmem>>, vector<64x32xf32>
    %cst_8 = arith.constant dense<0.000000e+00> : vector<8x32xf32>
    %9 = tpu.matmul %7, %8, %cst_8 {dimension_numbers = #tpu.dot_dimension_numbers<[1], [0], [0], [1], [0, 0, 1, 1], [], []>} : vector<8x64xf32>, vector<64x32xf32>, vector<8x32xf32> -> vector<8x32xf32>
    %c0_9 = arith.constant 0 : index
    %c0_10 = arith.constant 0 : index
    %10 = vector.load %arg2[%c0_9, %c0_10] : memref<8x32xf32, #tpu.memory_space<vmem>>, vector<8x32xf32>
    %c0_11 = arith.constant 0 : index
    %c0_12 = arith.constant 0 : index
    %11 = vector.load %arg6[%c0_11, %c0_12] : memref<1x32xf32, #tpu.memory_space<vmem>>, vector<1x32xf32>
    %12 = vector.broadcast %11 : vector<1x32xf32> to vector<8x32xf32>
    %13 = arith.addf %9, %12 : vector<8x32xf32>
    %c0_13 = arith.constant 0 : index
    %c0_14 = arith.constant 0 : index
    %14 = vector.load %arg7[%c0_13, %c0_14] : memref<1x32xf32, #tpu.memory_space<vmem>>, vector<1x32xf32>
    %c0_15 = arith.constant 0 : index
    %c0_16 = arith.constant 0 : index
    %15 = vector.load %arg8[%c0_15, %c0_16] : memref<1x32xf32, #tpu.memory_space<vmem>>, vector<1x32xf32>
    %16 = arith.addf %10, %13 : vector<8x32xf32>
    %cst_17 = arith.constant dense<0.000000e+00> : vector<8xf32>
    %17 = vector.multi_reduction <add>, %16, %cst_17 [1] : vector<8x32xf32> to vector<8xf32>
    %18 = vector.shape_cast %17 : vector<8xf32> to vector<8x1xf32>
    %cst_18 = arith.constant 3.200000e+01 : f32
    %19 = vector.broadcast %cst_18 : f32 to vector<8x1xf32>
    %20 = arith.divf %18, %19 : vector<8x1xf32>
    %21 = vector.broadcast %20 : vector<8x1xf32> to vector<8x32xf32>
    %22 = arith.subf %16, %21 : vector<8x32xf32>
    %23 = arith.mulf %22, %22 : vector<8x32xf32>
    %cst_19 = arith.constant dense<0.000000e+00> : vector<8xf32>
    %24 = vector.multi_reduction <add>, %23, %cst_19 [1] : vector<8x32xf32> to vector<8xf32>
    %25 = vector.shape_cast %24 : vector<8xf32> to vector<8x1xf32>
    %cst_20 = arith.constant 3.200000e+01 : f32
    %26 = vector.broadcast %cst_20 : f32 to vector<8x1xf32>
    %27 = arith.divf %25, %26 : vector<8x1xf32>
    %cst_21 = arith.constant 9.99999974E-6 : f32
    %28 = vector.broadcast %cst_21 : f32 to vector<8x1xf32>
    %29 = arith.addf %27, %28 : vector<8x1xf32>
    %30 = math.rsqrt %29 : vector<8x1xf32>
    %31 = vector.broadcast %30 : vector<8x1xf32> to vector<8x32xf32>
    %32 = arith.mulf %22, %31 : vector<8x32xf32>
    %33 = vector.broadcast %14 : vector<1x32xf32> to vector<8x32xf32>
    %34 = arith.mulf %32, %33 : vector<8x32xf32>
    %35 = vector.broadcast %15 : vector<1x32xf32> to vector<8x32xf32>
    %36 = arith.addf %34, %35 : vector<8x32xf32>
    %c0_22 = arith.constant 0 : index
    %c0_23 = arith.constant 0 : index
    %37 = vector.load %arg9[%c0_22, %c0_23] : memref<8x32xf32, #tpu.memory_space<vmem>>, vector<8x32xf32>
    tpu.vector_store %arg9[%c0_22, %c0_23], %36 {strides = array<i32>} : memref<8x32xf32, #tpu.memory_space<vmem>>, vector<8x32xf32>,
    return
  }
  func.func @transform_0(%arg0: i32, %arg1: i32) -> (i32, i32) {
    %c0_i32 = arith.constant 0 : i32
    %c0_i32_0 = arith.constant 0 : i32
    return %arg0, %c0_i32 : i32, i32
  }
  func.func @transform_1(%arg0: i32, %arg1: i32) -> (i32, i32) {
    %c0_i32 = arith.constant 0 : i32
    %c0_i32_0 = arith.constant 0 : i32
    return %c0_i32, %arg1 : i32, i32
  }
  func.func @transform_2(%arg0: i32, %arg1: i32) -> (i32, i32) {
    %c0_i32 = arith.constant 0 : i32
    %c0_i32_0 = arith.constant 0 : i32
    return %c0_i32, %arg1 : i32, i32
  }
  func.func @transform_3(%arg0: i32, %arg1: i32) -> (i32, i32) {
    %c0_i32 = arith.constant 0 : i32
    %c0_i32_0 = arith.constant 0 : i32
    return %arg1, %c0_i32 : i32, i32
  }
  func.func @transform_4(%arg0: i32, %arg1: i32) -> (i32, i32) {
    %c0_i32 = arith.constant 0 : i32
    %c0_i32_0 = arith.constant 0 : i32
    %c0_i32_1 = arith.constant 0 : i32
    return %c0_i32, %c0_i32_0 : i32, i32
  }
  func.func @transform_5(%arg0: i32, %arg1: i32) -> (i32, i32) {
    %c0_i32 = arith.constant 0 : i32
    %c0_i32_0 = arith.constant 0 : i32
    %c0_i32_1 = arith.constant 0 : i32
    return %c0_i32, %c0_i32_0 : i32, i32
  }
  func.func @transform_6(%arg0: i32, %arg1: i32) -> (i32, i32) {
    %c0_i32 = arith.constant 0 : i32
    %c0_i32_0 = arith.constant 0 : i32
    %c0_i32_1 = arith.constant 0 : i32
    return %c0_i32, %c0_i32_0 : i32, i32
  }
  func.func @transform_7(%arg0: i32, %arg1: i32) -> (i32, i32) {
    %c0_i32 = arith.constant 0 : i32
    %c0_i32_0 = arith.constant 0 : i32
    return %arg0, %c0_i32 : i32, i32
  }
}

module attributes {stable_mosaic.version = 11 : i64} {
  func.func @_ffn_kernel(%arg0: i32, %arg1: i32, %arg2: memref<8x32xf32, #tpu.memory_space<vmem>>, %arg3: memref<32x64xf32, #tpu.memory_space<vmem>>, %arg4: memref<1x64xf32, #tpu.memory_space<vmem>>, %arg5: memref<64x32xf32, #tpu.memory_space<vmem>>, %arg6: memref<1x32xf32, #tpu.memory_space<vmem>>, %arg7: memref<1x32xf32, #tpu.memory_space<vmem>>, %arg8: memref<1x32xf32, #tpu.memory_space<vmem>>, %arg9: memref<8x32xf32, #tpu.memory_space<vmem>>) attributes {dimension_semantics = [#tpu.dimension_semantics<parallel>, #tpu.dimension_semantics<arbitrary>], iteration_bounds = array<i64: 2, 1>, scalar_prefetch = 0 : i64, scratch_operands = 0 : i64, tpu.core_type = #tpu.core_type<tc>, window_params = [{transform_indices = @transform_0, window_bounds = array<i64: 8, 32>}, {transform_indices = @transform_1, window_bounds = array<i64: 32, 64>}, {transform_indices = @transform_2, window_bounds = array<i64: 1, 64>}, {transform_indices = @transform_3, window_bounds = array<i64: 64, 32>}, {pipeline_mode = #tpu.pipeline_mode<synchronous>, transform_indices = @transform_4, window_bounds = array<i64: 1, 32>}, {pipeline_mode = #tpu.pipeline_mode<synchronous>, transform_indices = @transform_5, window_bounds = array<i64: 1, 32>}, {pipeline_mode = #tpu.pipeline_mode<synchronous>, transform_indices = @transform_6, window_bounds = array<i64: 1, 32>}, {transform_indices = @transform_7, window_bounds = array<i64: 8, 32>}]} {
    %c0 = arith.constant 0 : index
    %c0_0 = arith.constant 0 : index
    %0 = vector.load %arg2[%c0, %c0_0] : memref<8x32xf32, #tpu.memory_space<vmem>>, vector<8x32xf32>
    %c0_1 = arith.constant 0 : index
    %c0_2 = arith.constant 0 : index
    %1 = vector.load %arg3[%c0_1, %c0_2] : memref<32x64xf32, #tpu.memory_space<vmem>>, vector<32x64xf32>
    %cst = arith.constant dense<0.000000e+00> : vector<8x64xf32>
    %2 = tpu.matmul %0, %1, %cst {dimension_numbers = #tpu.dot_dimension_numbers<[1], [0], [0], [1], [0, 0, 1, 1], [], []>} : vector<8x32xf32>, vector<32x64xf32>, vector<8x64xf32> -> vector<8x64xf32>
    %c0_3 = arith.constant 0 : index
    %c0_4 = arith.constant 0 : index
    %3 = vector.load %arg4[%c0_3, %c0_4] : memref<1x64xf32, #tpu.memory_space<vmem>>, vector<1x64xf32>
    %4 = vector.broadcast %3 : vector<1x64xf32> to vector<8x64xf32>
    %5 = arith.addf %2, %4 : vector<8x64xf32>
    %cst_5 = arith.constant 0.000000e+00 : f32
    %6 = vector.broadcast %cst_5 : f32 to vector<8x64xf32>
    %7 = arith.maximumf %5, %6 : vector<8x64xf32>
    %c0_6 = arith.constant 0 : index
    %c0_7 = arith.constant 0 : index
    %8 = vector.load %arg5[%c0_6, %c0_7] : memref<64x32xf32, #tpu.memory_space<vmem>>, vector<64x32xf32>
    %cst_8 = arith.constant dense<0.000000e+00> : vector<8x32xf32>
    %9 = tpu.matmul %7, %8, %cst_8 {dimension_numbers = #tpu.dot_dimension_numbers<[1], [0], [0], [1], [0, 0, 1, 1], [], []>} : vector<8x64xf32>, vector<64x32xf32>, vector<8x32xf32> -> vector<8x32xf32>
    %c0_9 = arith.constant 0 : index
    %c0_10 = arith.constant 0 : index
    %10 = vector.load %arg2[%c0_9, %c0_10] : memref<8x32xf32, #tpu.memory_space<vmem>>, vector<8x32xf32>
    %c0_11 = arith.constant 0 : index
    %c0_12 = arith.constant 0 : index
    %11 = vector.load %arg6[%c0_11, %c0_12] : memref<1x32xf32, #tpu.memory_space<vmem>>, vector<1x32xf32>
    %12 = vector.broadcast %11 : vector<1x32xf32> to vector<8x32xf32>
    %13 = arith.addf %9, %12 : vector<8x32xf32>
    %c0_13 = arith.constant 0 : index
    %c0_14 = arith.constant 0 : index
    %14 = vector.load %arg7[%c0_13, %c0_14] : memref<1x32xf32, #tpu.memory_space<vmem>>, vector<1x32xf32>
    %c0_15 = arith.constant 0 : index
    %c0_16 = arith.constant 0 : index
    %15 = vector.load %arg8[%c0_15, %c0_16] : memref<1x32xf32, #tpu.memory_space<vmem>>, vector<1x32xf32>
    %16 = arith.addf %10, %13 : vector<8x32xf32>
    %cst_17 = arith.constant dense<0.000000e+00> : vector<8xf32>
    %17 = vector.multi_reduction <add>, %16, %cst_17 [1] : vector<8x32xf32> to vector<8xf32>
    %18 = vector.shape_cast %17 : vector<8xf32> to vector<8x1xf32>
    %cst_18 = arith.constant 3.200000e+01 : f32
    %19 = vector.broadcast %cst_18 : f32 to vector<8x1xf32>
    %20 = arith.divf %18, %19 : vector<8x1xf32>
    %21 = vector.broadcast %20 : vector<8x1xf32> to vector<8x32xf32>
    %22 = arith.subf %16, %21 : vector<8x32xf32>
    %23 = arith.mulf %22, %22 : vector<8x32xf32>
    %cst_19 = arith.constant dense<0.000000e+00> : vector<8xf32>
    %24 = vector.multi_reduction <add>, %23, %cst_19 [1] : vector<8x32xf32> to vector<8xf32>
    %25 = vector.shape_cast %24 : vector<8xf32> to vector<8x1xf32>
    %cst_20 = arith.constant 3.200000e+01 : f32
    %26 = vector.broadcast %cst_20 : f32 to vector<8x1xf32>
    %27 = arith.divf %25, %26 : vector<8x1xf32>
    %cst_21 = arith.constant 9.99999974E-6 : f32
    %28 = vector.broadcast %cst_21 : f32 to vector<8x1xf32>
    %29 = arith.addf %27, %28 : vector<8x1xf32>
    %30 = math.rsqrt %29 : vector<8x1xf32>
    %31 = vector.broadcast %30 : vector<8x1xf32> to vector<8x32xf32>
    %32 = arith.mulf %22, %31 : vector<8x32xf32>
    %33 = vector.broadcast %14 : vector<1x32xf32> to vector<8x32xf32>
    %34 = arith.mulf %32, %33 : vector<8x32xf32>
    %35 = vector.broadcast %15 : vector<1x32xf32> to vector<8x32xf32>
    %36 = arith.addf %34, %35 : vector<8x32xf32>
    %c0_22 = arith.constant 0 : index
    %c0_23 = arith.constant 0 : index
    %37 = vector.load %arg9[%c0_22, %c0_23] : memref<8x32xf32, #tpu.memory_space<vmem>>, vector<8x32xf32>
    tpu.vector_store %arg9[%c0_22, %c0_23], %36 {strides = array<i32>} : memref<8x32xf32, #tpu.memory_space<vmem>>, vector<8x32xf32>,
    return
  }
  func.func @transform_0(%arg0: i32, %arg1: i32) -> (i32, i32) {
    %c0_i32 = arith.constant 0 : i32
    %c0_i32_0 = arith.constant 0 : i32
    return %arg0, %c0_i32 : i32, i32
  }
  func.func @transform_1(%arg0: i32, %arg1: i32) -> (i32, i32) {
    %c0_i32 = arith.constant 0 : i32
    %c0_i32_0 = arith.constant 0 : i32
    return %c0_i32, %arg1 : i32, i32
  }
  func.func @transform_2(%arg0: i32, %arg1: i32) -> (i32, i32) {
    %c0_i32 = arith.constant 0 : i32
    %c0_i32_0 = arith.constant 0 : i32
    return %c0_i32, %arg1 : i32, i32
  }
  func.func @transform_3(%arg0: i32, %arg1: i32) -> (i32, i32) {
    %c0_i32 = arith.constant 0 : i32
    %c0_i32_0 = arith.constant 0 : i32
    return %arg1, %c0_i32 : i32, i32
  }
  func.func @transform_4(%arg0: i32, %arg1: i32) -> (i32, i32) {
    %c0_i32 = arith.constant 0 : i32
    %c0_i32_0 = arith.constant 0 : i32
    %c0_i32_1 = arith.constant 0 : i32
    return %c0_i32, %c0_i32_0 : i32, i32
  }
  func.func @transform_5(%arg0: i32, %arg1: i32) -> (i32, i32) {
    %c0_i32 = arith.constant 0 : i32
    %c0_i32_0 = arith.constant 0 : i32
    %c0_i32_1 = arith.constant 0 : i32
    return %c0_i32, %c0_i32_0 : i32, i32
  }
  func.func @transform_6(%arg0: i32, %arg1: i32) -> (i32, i32) {
    %c0_i32 = arith.constant 0 : i32
    %c0_i32_0 = arith.constant 0 : i32
    %c0_i32_1 = arith.constant 0 : i32
    return %c0_i32, %c0_i32_0 : i32, i32
  }
  func.func @transform_7(%arg0: i32, %arg1: i32) -> (i32, i32) {
    %c0_i32 = arith.constant 0 : i32
    %c0_i32_0 = arith.constant 0 : i32
    return %arg0, %c0_i32 : i32, i32
  }
}

</mosaic_0001>

<bundles_post_ra>
// kernel: tpu_custom_call.1
= control target key start
LH: loop header
LB: loop body
LE: loop exit
PB: predicated region body
PF: predicated region fallthrough
CT: control target
= control target key end

     0   :  { %12 = vsyncpa [#allocation3], 0  ;;  %s1100_s0 = inlined_call_operand.vmem [shape: f32[16,32], index: 0, kind: input, shape index: {}]   ;;  %s1101_s1 = inlined_call_operand.vmem [shape: f32[32,64], index: 1, kind: input, shape index: {}]   ;;  %s1102_s2 = inlined_call_operand.vmem [shape: f32[1,64], index: 2, kind: input, shape index: {}]   ;;  %s1103_s3 = inlined_call_operand.vmem [shape: f32[64,32], index: 3, kind: input, shape index: {}]   ;;  %s1104_s4 = inlined_call_operand.vmem [shape: f32[1,32], index: 4, kind: input, shape index: {}]   ;;  %s1105_s5 = inlined_call_operand.vmem [shape: f32[1,32], index: 5, kind: input, shape index: {}]   ;;  %s1106_s6 = inlined_call_operand.vmem [shape: f32[1,32], index: 6, kind: input, shape index: {}]   ;;  %s1107_s7 = inlined_call_operand.hbm [shape: f32[16,32], index: 7, kind: output, shape index: {}]  }
   0x1   :  { %14 = vsyncpa [#allocation3 + $0x1], 0  ;;  %s936_s24 = smov 0   ;;  %s938_s25 = smov 0  }
   0x2   :  { %s940_s26 = smov 0   ;;  %s942_s27 = smov 0  }
   0x3   :  { %s944_s28 = smov 0   ;;  %s946_s29 = smov 0  }
   0x4 LB: > { %s670_s30 = sadd.s32 4294967295, %s890_s29   ;;  %s671_s8 = sadd.s32 4294967294, %s890_s29   ;;  %s890_s29 = sphi %s946_s29, %s20_s29   ;;  %s886_s28 = sphi %s944_s28, %s1114_s28   ;;  %s882_s27 = sphi %s942_s27, %s1113_s27   ;;  %s878_s26 = sphi %s940_s26, %s1112_s26   ;;  %s874_s25 = sphi %s938_s25, %s1111_s25   ;;  %s870_s24 = sphi %s936_s24, %s1110_s24  }
   0x5   : > { %s32_s9 = sadd.s32 1, %s886_s28  ;;  %s206_s10 = sadd.s32 1, %s878_s26 }
   0x6   : > { %p34_p0 = scmp.ge.s32.totalorder %s32_s9, 2  ;;  %p216_p1 = scmp.ne.s32.totalorder %s878_s26, %s874_s25 }
   0x7   : > { %p217_p2 = scmp.eq.s32.totalorder %s670_s30, 1  ;;  %p222_p3 = scmp.ne.s32.totalorder %s874_s25, %s870_s24 }
   0x8   : > { %s1116_s9 = smov (%p34_p0, %s32_s9), 0  ;;  %p223_p5 = scmp.eq.s32.totalorder %s671_s8, 1 }
   0x9   : > { %p976_p4 = por %p217_p2, %p216_p1  ;;  %s203_s12 = ssub.s32 %s886_s28, %s1116_s9 }
   0xa   : > { %p677_p6 = scmp.ge.s32.totalorder %s890_s29, 1  ;;  %p204_p7 = scmp.eq.s32.totalorder %s203_s12, 0 }
   0xb   : > { %p983_p8 = por %p223_p5, %p222_p3  ;;  %p279_p9 = scmp.lt.s32.totalorder %s890_s29, 3 }
   0xc   : > { %s989_s14 = scalar_select %p204_p7, %s878_s26, %s206_s10  }
   0xd   : > { %p280_p10 = pnand %p677_p6, %p279_p9 }
   0xe   : > { %v340_v0 = vld [vmem:[%s1101_s1] sm:$0xff] (!%p280_p10)  ;;  %v341_v1 = vld [vmem:[%s1101_s1 + $0x8] sm:$0xff] (!%p280_p10)  ;;  %v342_v2 = vld [vmem:[%s1101_s1 + $0x10] sm:$0xff] (!%p280_p10)  ;;  %v892_v3 = vmov (!%p280_p10), 0.0|0.0   ;;  %vm893_vm0 = vmmov (!%p280_p10), 0   ;;  %v894_v6 = vmov (!%p280_p10), 0.0  }
   0xf   : > { %283 = sbr.rel (%p280_p10) target bundleno = 786 (0x312), region = 48  ;;  %734 = vmatprep.subr.bf16.mxu0 (!%p280_p10), %v892_v3  ;;  %v735_v4 = vpack.c.bf16 (!%p280_p10), %v341_v1, %v340_v0  ;;  %v343_v5 = vld [vmem:[%s1101_s1 + $0x18] sm:$0xff] (!%p280_p10)  ;;  %712 = vmatprep.mubr.msk.f32.mxu0 (!%p280_p10), %vm893_vm0, %v894_v6  ;;  %p322_p11 = scmp.lt.s32.totalorder (!%p280_p10), %s882_s27, 1  ;;  %v426_v7 = vld [vmem:[%s1103_s3] sm:$0xff] (!%p280_p10)  ;;  %v427_v8 = vld [vmem:[%s1103_s3 + $0x8] sm:$0xff] (!%p280_p10)  ;;  %vm351_vm1 = vcmask (!%p280_p10), 261120  }
  0x10   : > { %740 = vmatprep.subr.bf16.mxu1 (!%p280_p10), %v892_v3  ;;  %v741_v9 = vpack.c.bf16 (!%p280_p10), %v427_v8, %v426_v7  ;;  %v428_v10 = vld [vmem:[%s1103_s3 + $0x10] sm:$0xff] (!%p280_p10)  ;;  %v429_v11 = vld [vmem:[%s1103_s3 + $0x18] sm:$0xff] (!%p280_p10)  ;;  %731 = vmatprep.mubr.msk.f32.mxu1 (!%p280_p10), %vm893_vm0, %v894_v6  ;;  %v738_v12 = vpack.c.bf16 (!%p280_p10), %v343_v5, %v342_v2  ;;  %v430_v14 = vld [vmem:[%s1103_s3 + $0x20] sm:$0xff] (!%p280_p10)  ;;  %vm441_vm2 = vcmask (!%p280_p10), 523264   ;;  %s319_s22 = sand.u32 (!%p280_p10), 1, %s874_s25   ;;  %s687_s15 = sshll.u32 (!%p280_p10), %s882_s27, 7 }
  0x11   : > { %736 = vmatpush3.bf16.msra.mxu0 (!%p280_p10), %v735_v4  ;;  %v744_v13 = vpack.c.bf16 (!%p280_p10), %v429_v11, %v428_v10  ;;  %v431_v15 = vld [vmem:[%s1103_s3 + $0x28] sm:$0xff] (!%p280_p10)  ;;  %v432_v18 = vld [vmem:[%s1103_s3 + $0x30] sm:$0xff] (!%p280_p10)  ;;  %v433_v19 = vld [vmem:[%s1103_s3 + $0x38] sm:$0xff] (!%p280_p10)  ;;  %s678_s23 = sshll.u32 (!%p280_p10), %s319_s22, 3  ;;  %s1052_s20 = scalar_lea.hbm (!%p280_p10), %s1107_s7, %s687_s15 }
  0x12   : > { %737 = vmatprep.subr.bf16.mxu0 (!%p280_p10), %v892_v3  ;;  %742 = vmatpush3.bf16.msra.mxu1 (!%p280_p10), %v741_v9  ;;  %v747_v17 = vpack.c.bf16 (!%p280_p10), %v431_v15, %v430_v14  ;;  %v750_v20 = vpack.c.bf16 (!%p280_p10), %v433_v19, %v432_v18  ;;  %v680_v21 = vld [vmem:[%s1102_s2] ss:$0 sm:$0xff] (!%p280_p10)  ;;  %s321_s16 = scalar_lea.vmem (!%p280_p10), [#allocation2], %s678_s23  ;;  %s548_s21 = scalar_lea.sflag (!%p280_p10), [#allocation3], %s319_s22 }
  0x13   : > { %743 = vmatprep.subr.bf16.mxu1 (!%p280_p10), %v892_v3  ;;  %v682_v26 = vld [vmem:[%s1104_s4] ss:$0 sm:$0xff] (!%p280_p10)  ;;  %s561_s17 = sshll.u32 (!%p280_p10), %s321_s16, 4  ;;  %s1054_s17 = int_to_ptr.vmem [resolvable:$true] %s561_s17 }
  0x14   : > { %v684_v41 = vld [vmem:[%s1105_s5] ss:$0 sm:$0xff] (!%p280_p10)  ;;  %s812_s30 = scalar_lea.vmem (!%p280_p10), %s1054_s17, 128 }
  0x15   : > { %739 = vmatpush3.bf16.msra.mxu0 (!%p280_p10), %v738_v12  ;;  %v685_v43 = vld [vmem:[%s1106_s6] ss:$0 sm:$0xff] (!%p280_p10)  ;;  %p813_p12 = scmp.ne.s32.totalorder (!%p280_p10), %s1054_s17, %s812_s30 }
  0x16   : > { %s323_s18 = scalar_select %p322_p11, %s882_s27, 1  ;;  %745 = vmatpush3.bf16.msra.mxu1 %v744_v13 }
  0x17   : > { %746 = vmatprep.subr.bf16.mxu1 %v892_v3  ;;  %p814_p13 = pnand %p813_p12, %p976_p4  ;;  %s895_s27 = smov [#allocation2]  }
  0x18   : > { %s679_s19 = sshll.u32 %s323_s18, 3  ;;  %s816_s23 = sshll.u32 %s895_s27, 4  ;;  %s817_s23 = int_to_ptr.vmem [resolvable:$false] %s816_s23 }
  0x19   : > { %s325_s10 = scalar_lea.vmem %s1100_s0, %s679_s19  ;;  %p815_p0 = pneg %p814_p13 }
  0x1a   : > { %v339_v16 = vld [vmem:[%s325_s10] sm:$0xff]  ;;  %748 = vmatpush3.bf16.msra.mxu1 %v747_v17  ;;  %s818_s8 = scalar_lea.vmem %s817_s23, 256  ;;  %p819_p1 = scmp.lt.s32.totalorder %s1054_s17, %s817_s23 }
  0x1b   : > { %713 = vmatmul.mubr.msk.f32.vlgmr.msra.gmra.mrb[0].mxu0 %vm351_vm1, %v339_v16  ;;  %749 = vmatprep.subr.bf16.mxu1 %v892_v3  ;;  %p820_p2 = scmp.lt.s32.totalorder %s818_s8, %s812_s30 }
  0x1d   : > { %p821_p3 = por %p820_p2, %p819_p1 }
  0x1e   : > { %751 = vmatpush3.bf16.msra.mxu1 %v750_v20 }
  0x1f   : > { %p822_p5 = pnand %p821_p3, %p815_p0 }
  0xee   : > { %v421_v22 = vpop.f32.mrb[0].mxu0 }
  0xef   : > { %v422_v23 = vadd.f32 %v680_v21, %v421_v22  ;;  %v714_v24 = vpop.f32.mrb[1].mxu0 }
  0xf1   : > { %v425_v25 = vmax.f32 %v422_v23, 0.0 }
  0xf3   : > { %732 = vmatmul.mubr.msk.f32.vlgmr.msra.gmra.mrb[0].mxu1 %vm441_vm2, %v425_v25 }
 0x1c6   : > { %v511_v27 = vpop.f32.mrb[0].mxu1 }
 0x1c7   : > { %v512_v28 = vadd.f32 %v682_v26, %v511_v27  ;;  %v733_v29 = vpop.f32.mrb[1].mxu1 }
 0x1c9   : > { %v517_v30 = vadd.f32 %v512_v28, %v339_v16 }
 0x1cb   : > { %v518_v31 = vsel %vm351_vm1, %v517_v30, 0.0 }
 0x1cc   : > { %519 = vadd.xlane.f32.xlu0 %v518_v31 }
 0x259   : > { %v520_v32 = vpop.xlane.xlu0 %519 }
 0x25a   : > { %v522_v33 = vmul.f32 0.03125, %v520_v32 }
 0x25c   : > { %v523_v34 = vsub.f32 %v517_v30, %v522_v33 }
 0x25e   : > { %v524_v35 = vmul.f32 %v523_v34, %v523_v34 }
 0x260   : > { %v525_v36 = vsel %vm351_vm1, %v524_v35, 0.0 }
 0x261   : > { %526 = vadd.xlane.f32.xlu0 %v525_v36 }
 0x2ee   : > { %v527_v37 = vpop.xlane.xlu0 %526 }
 0x2ef   : > { %v528_v38 = vmul.f32 0.03125, %v527_v37 }
 0x2f1   : > { %v529_v39 = vadd.f32 1e-05, %v528_v38 }
 0x2f3   : > { %810 = vrsqrt.f32 %v529_v39 }
 0x2fd   : > { %v811_v40 = vpop.eup %810 }
 0x2fe   : > { %v531_v42 = vmul.f32 %v811_v40, %v523_v34 }
 0x300   : > { %v538_v44 = vmul.f32 %v684_v41, %v531_v42 }
 0x302   : > { %v545_v45 = vadd.f32 %v685_v43, %v538_v44 }
 0x304   : > { %546 = vst.msk [vmem:[%s321_s16] sm:$0xff] %vm351_vm1, %v545_v45 }
 0x305   : > { %825 = shalt.err (!%p822_p5)
}
 0x306   : > { %s826_s22 = scalar_lea.hbm %s1052_s20, 128  ;;  %s830_s15 = scalar_lea.hbm %s1107_s7, 256 }
 0x307   : > { %p827_p6 = scmp.ne.s32.totalorder %s1052_s20, %s826_s22  ;;  %p831_p10 = scmp.lt.u32.totalorder %s1052_s20, %s1107_s7 }
 0x308   : > { %p832_p11 = scmp.lt.u32.totalorder %s830_s15, %s826_s22  ;;  %p834_p13 = scmp.lt.u32.totalorder %s826_s22, %s1052_s20 }
 0x309   : > { %p828_p7 = pnand %p827_p6, %p976_p4 }
 0x30a   : > { %p833_p12 = por %p832_p11, %p831_p10 }
 0x30b   : > { %p829_p9 = pneg %p828_p7 }
 0x30c   : > { %p835_p0 = por %p834_p13, %p833_p12 }
 0x30e   : > { %p836_p1 = pnand %p835_p0, %p829_p9 }
 0x310   : > { %839 = shalt.err (!%p836_p1)
}
 0x311   : > { %752 = dma.vmem_to_hbm [thread:$0]  (%p976_p4), %s1054_s17, 128, %s1052_s20, %s548_s21  }
 0x312 PF: > { %p758_p2 = scmp.ge.s32.totalorder %s890_s29, 2  ;;  %s573_s19 = sand.u32 1, %s870_s24  }
 0x313   : > { %s574_s30 = scalar_lea.sflag [#allocation3], %s573_s19 }
 0x314   : > { %p755_p3 = pnand %p758_p2, %p983_p8 }
 0x316   : > { %865 = dma.done.wait (!%p755_p3), %s574_s30, 128  }
 0x317   : > { %867 = vsyncadd (!%p755_p3), %s574_s30, 4294967168  ;;  %s20_s29 = sadd.s32 1, %s890_s29   ;;  %s1110_s24 = smov %s874_s25 }
 0x318   : > { %p17_p5 = scmp.ge.s32.totalorder %s20_s29, 4   ;;  %s1111_s25 = smov %s878_s26 }
 0x319   : > { %s1112_s26 = smov %s989_s14  ;;  %s1113_s27 = smov %s886_s28 }
 0x31a   : > { %s1114_s28 = smov %s1116_s9  ;;  %19 = sbr.rel (!%p17_p5) target bundleno = 4 (0x4), region = 92 }
 0x321   :  { %579 = vsyncpa [#allocation3], 1 }
 0x322   :  { %581 = vsyncpa [#allocation3 + $0x1], 1 }

// kernel: tpu_custom_call.1
= control target key start
LH: loop header
LB: loop body
LE: loop exit
PB: predicated region body
PF: predicated region fallthrough
CT: control target
= control target key end

     0   :  { %12 = vsyncpa [#allocation3], 0  ;;  %s1100_s0 = inlined_call_operand.vmem [shape: f32[16,32], index: 0, kind: input, shape index: {}]   ;;  %s1101_s1 = inlined_call_operand.vmem [shape: f32[32,64], index: 1, kind: input, shape index: {}]   ;;  %s1102_s2 = inlined_call_operand.vmem [shape: f32[1,64], index: 2, kind: input, shape index: {}]   ;;  %s1103_s3 = inlined_call_operand.vmem [shape: f32[64,32], index: 3, kind: input, shape index: {}]   ;;  %s1104_s4 = inlined_call_operand.vmem [shape: f32[1,32], index: 4, kind: input, shape index: {}]   ;;  %s1105_s5 = inlined_call_operand.vmem [shape: f32[1,32], index: 5, kind: input, shape index: {}]   ;;  %s1106_s6 = inlined_call_operand.vmem [shape: f32[1,32], index: 6, kind: input, shape index: {}]   ;;  %s1107_s7 = inlined_call_operand.hbm [shape: f32[16,32], index: 7, kind: output, shape index: {}]  }
   0x1   :  { %14 = vsyncpa [#allocation3 + $0x1], 0  ;;  %s936_s24 = smov 0   ;;  %s938_s25 = smov 0  }
   0x2   :  { %s940_s26 = smov 0   ;;  %s942_s27 = smov 0  }
   0x3   :  { %s944_s28 = smov 0   ;;  %s946_s29 = smov 0  }
   0x4 LB: > { %s670_s30 = sadd.s32 4294967295, %s890_s29   ;;  %s671_s8 = sadd.s32 4294967294, %s890_s29   ;;  %s890_s29 = sphi %s946_s29, %s20_s29   ;;  %s886_s28 = sphi %s944_s28, %s1114_s28   ;;  %s882_s27 = sphi %s942_s27, %s1113_s27   ;;  %s878_s26 = sphi %s940_s26, %s1112_s26   ;;  %s874_s25 = sphi %s938_s25, %s1111_s25   ;;  %s870_s24 = sphi %s936_s24, %s1110_s24  }
   0x5   : > { %s32_s9 = sadd.s32 1, %s886_s28  ;;  %s206_s10 = sadd.s32 1, %s878_s26 }
   0x6   : > { %p34_p0 = scmp.ge.s32.totalorder %s32_s9, 2  ;;  %p216_p1 = scmp.ne.s32.totalorder %s878_s26, %s874_s25 }
   0x7   : > { %p217_p2 = scmp.eq.s32.totalorder %s670_s30, 1  ;;  %p222_p3 = scmp.ne.s32.totalorder %s874_s25, %s870_s24 }
   0x8   : > { %s1116_s9 = smov (%p34_p0, %s32_s9), 0  ;;  %p223_p5 = scmp.eq.s32.totalorder %s671_s8, 1 }
   0x9   : > { %p976_p4 = por %p217_p2, %p216_p1  ;;  %s203_s12 = ssub.s32 %s886_s28, %s1116_s9 }
   0xa   : > { %p677_p6 = scmp.ge.s32.totalorder %s890_s29, 1  ;;  %p204_p7 = scmp.eq.s32.totalorder %s203_s12, 0 }
   0xb   : > { %p983_p8 = por %p223_p5, %p222_p3  ;;  %p279_p9 = scmp.lt.s32.totalorder %s890_s29, 3 }
   0xc   : > { %s989_s14 = scalar_select %p204_p7, %s878_s26, %s206_s10  }
   0xd   : > { %p280_p10 = pnand %p677_p6, %p279_p9 }
   0xe   : > { %v340_v0 = vld [vmem:[%s1101_s1] sm:$0xff] (!%p280_p10)  ;;  %v341_v1 = vld [vmem:[%s1101_s1 + $0x8] sm:$0xff] (!%p280_p10)  ;;  %v342_v2 = vld [vmem:[%s1101_s1 + $0x10] sm:$0xff] (!%p280_p10)  ;;  %v892_v3 = vmov (!%p280_p10), 0.0|0.0   ;;  %vm893_vm0 = vmmov (!%p280_p10), 0   ;;  %v894_v6 = vmov (!%p280_p10), 0.0  }
   0xf   : > { %283 = sbr.rel (%p280_p10) target bundleno = 786 (0x312), region = 48  ;;  %734 = vmatprep.subr.bf16.mxu0 (!%p280_p10), %v892_v3  ;;  %v735_v4 = vpack.c.bf16 (!%p280_p10), %v341_v1, %v340_v0  ;;  %v343_v5 = vld [vmem:[%s1101_s1 + $0x18] sm:$0xff] (!%p280_p10)  ;;  %712 = vmatprep.mubr.msk.f32.mxu0 (!%p280_p10), %vm893_vm0, %v894_v6  ;;  %p322_p11 = scmp.lt.s32.totalorder (!%p280_p10), %s882_s27, 1  ;;  %v426_v7 = vld [vmem:[%s1103_s3] sm:$0xff] (!%p280_p10)  ;;  %v427_v8 = vld [vmem:[%s1103_s3 + $0x8] sm:$0xff] (!%p280_p10)  ;;  %vm351_vm1 = vcmask (!%p280_p10), 261120  }
  0x10   : > { %740 = vmatprep.subr.bf16.mxu1 (!%p280_p10), %v892_v3  ;;  %v741_v9 = vpack.c.bf16 (!%p280_p10), %v427_v8, %v426_v7  ;;  %v428_v10 = vld [vmem:[%s1103_s3 + $0x10] sm:$0xff] (!%p280_p10)  ;;  %v429_v11 = vld [vmem:[%s1103_s3 + $0x18] sm:$0xff] (!%p280_p10)  ;;  %731 = vmatprep.mubr.msk.f32.mxu1 (!%p280_p10), %vm893_vm0, %v894_v6  ;;  %v738_v12 = vpack.c.bf16 (!%p280_p10), %v343_v5, %v342_v2  ;;  %v430_v14 = vld [vmem:[%s1103_s3 + $0x20] sm:$0xff] (!%p280_p10)  ;;  %vm441_vm2 = vcmask (!%p280_p10), 523264   ;;  %s319_s22 = sand.u32 (!%p280_p10), 1, %s874_s25   ;;  %s687_s15 = sshll.u32 (!%p280_p10), %s882_s27, 7 }
  0x11   : > { %736 = vmatpush3.bf16.msra.mxu0 (!%p280_p10), %v735_v4  ;;  %v744_v13 = vpack.c.bf16 (!%p280_p10), %v429_v11, %v428_v10  ;;  %v431_v15 = vld [vmem:[%s1103_s3 + $0x28] sm:$0xff] (!%p280_p10)  ;;  %v432_v18 = vld [vmem:[%s1103_s3 + $0x30] sm:$0xff] (!%p280_p10)  ;;  %v433_v19 = vld [vmem:[%s1103_s3 + $0x38] sm:$0xff] (!%p280_p10)  ;;  %s678_s23 = sshll.u32 (!%p280_p10), %s319_s22, 3  ;;  %s1052_s20 = scalar_lea.hbm (!%p280_p10), %s1107_s7, %s687_s15 }
  0x12   : > { %737 = vmatprep.subr.bf16.mxu0 (!%p280_p10), %v892_v3  ;;  %742 = vmatpush3.bf16.msra.mxu1 (!%p280_p10), %v741_v9  ;;  %v747_v17 = vpack.c.bf16 (!%p280_p10), %v431_v15, %v430_v14  ;;  %v750_v20 = vpack.c.bf16 (!%p280_p10), %v433_v19, %v432_v18  ;;  %v680_v21 = vld [vmem:[%s1102_s2] ss:$0 sm:$0xff] (!%p280_p10)  ;;  %s321_s16 = scalar_lea.vmem (!%p280_p10), [#allocation2], %s678_s23  ;;  %s548_s21 = scalar_lea.sflag (!%p280_p10), [#allocation3], %s319_s22 }
  0x13   : > { %743 = vmatprep.subr.bf16.mxu1 (!%p280_p10), %v892_v3  ;;  %v682_v26 = vld [vmem:[%s1104_s4] ss:$0 sm:$0xff] (!%p280_p10)  ;;  %s561_s17 = sshll.u32 (!%p280_p10), %s321_s16, 4  ;;  %s1054_s17 = int_to_ptr.vmem [resolvable:$true] %s561_s17 }
  0x14   : > { %v684_v41 = vld [vmem:[%s1105_s5] ss:$0 sm:$0xff] (!%p280_p10)  ;;  %s812_s30 = scalar_lea.vmem (!%p280_p10), %s1054_s17, 128 }
  0x15   : > { %739 = vmatpush3.bf16.msra.mxu0 (!%p280_p10), %v738_v12  ;;  %v685_v43 = vld [vmem:[%s1106_s6] ss:$0 sm:$0xff] (!%p280_p10)  ;;  %p813_p12 = scmp.ne.s32.totalorder (!%p280_p10), %s1054_s17, %s812_s30 }
  0x16   : > { %s323_s18 = scalar_select %p322_p11, %s882_s27, 1  ;;  %745 = vmatpush3.bf16.msra.mxu1 %v744_v13 }
  0x17   : > { %746 = vmatprep.subr.bf16.mxu1 %v892_v3  ;;  %p814_p13 = pnand %p813_p12, %p976_p4  ;;  %s895_s27 = smov [#allocation2]  }
  0x18   : > { %s679_s19 = sshll.u32 %s323_s18, 3  ;;  %s816_s23 = sshll.u32 %s895_s27, 4  ;;  %s817_s23 = int_to_ptr.vmem [resolvable:$false] %s816_s23 }
  0x19   : > { %s325_s10 = scalar_lea.vmem %s1100_s0, %s679_s19  ;;  %p815_p0 = pneg %p814_p13 }
  0x1a   : > { %v339_v16 = vld [vmem:[%s325_s10] sm:$0xff]  ;;  %748 = vmatpush3.bf16.msra.mxu1 %v747_v17  ;;  %s818_s8 = scalar_lea.vmem %s817_s23, 256  ;;  %p819_p1 = scmp.lt.s32.totalorder %s1054_s17, %s817_s23 }
  0x1b   : > { %713 = vmatmul.mubr.msk.f32.vlgmr.msra.gmra.mrb[0].mxu0 %vm351_vm1, %v339_v16  ;;  %749 = vmatprep.subr.bf16.mxu1 %v892_v3  ;;  %p820_p2 = scmp.lt.s32.totalorder %s818_s8, %s812_s30 }
  0x1d   : > { %p821_p3 = por %p820_p2, %p819_p1 }
  0x1e   : > { %751 = vmatpush3.bf16.msra.mxu1 %v750_v20 }
  0x1f   : > { %p822_p5 = pnand %p821_p3, %p815_p0 }
  0xee   : > { %v421_v22 = vpop.f32.mrb[0].mxu0 }
  0xef   : > { %v422_v23 = vadd.f32 %v680_v21, %v421_v22  ;;  %v714_v24 = vpop.f32.mrb[1].mxu0 }
  0xf1   : > { %v425_v25 = vmax.f32 %v422_v23, 0.0 }
  0xf3   : > { %732 = vmatmul.mubr.msk.f32.vlgmr.msra.gmra.mrb[0].mxu1 %vm441_vm2, %v425_v25 }
 0x1c6   : > { %v511_v27 = vpop.f32.mrb[0].mxu1 }
 0x1c7   : > { %v512_v28 = vadd.f32 %v682_v26, %v511_v27  ;;  %v733_v29 = vpop.f32.mrb[1].mxu1 }
 0x1c9   : > { %v517_v30 = vadd.f32 %v512_v28, %v339_v16 }
 0x1cb   : > { %v518_v31 = vsel %vm351_vm1, %v517_v30, 0.0 }
 0x1cc   : > { %519 = vadd.xlane.f32.xlu0 %v518_v31 }
 0x259   : > { %v520_v32 = vpop.xlane.xlu0 %519 }
 0x25a   : > { %v522_v33 = vmul.f32 0.03125, %v520_v32 }
 0x25c   : > { %v523_v34 = vsub.f32 %v517_v30, %v522_v33 }
 0x25e   : > { %v524_v35 = vmul.f32 %v523_v34, %v523_v34 }
 0x260   : > { %v525_v36 = vsel %vm351_vm1, %v524_v35, 0.0 }
 0x261   : > { %526 = vadd.xlane.f32.xlu0 %v525_v36 }
 0x2ee   : > { %v527_v37 = vpop.xlane.xlu0 %526 }
 0x2ef   : > { %v528_v38 = vmul.f32 0.03125, %v527_v37 }
 0x2f1   : > { %v529_v39 = vadd.f32 1e-05, %v528_v38 }
 0x2f3   : > { %810 = vrsqrt.f32 %v529_v39 }
 0x2fd   : > { %v811_v40 = vpop.eup %810 }
 0x2fe   : > { %v531_v42 = vmul.f32 %v811_v40, %v523_v34 }
 0x300   : > { %v538_v44 = vmul.f32 %v684_v41, %v531_v42 }
 0x302   : > { %v545_v45 = vadd.f32 %v685_v43, %v538_v44 }
 0x304   : > { %546 = vst.msk [vmem:[%s321_s16] sm:$0xff] %vm351_vm1, %v545_v45 }
 0x305   : > { %825 = shalt.err (!%p822_p5)
}
 0x306   : > { %s826_s22 = scalar_lea.hbm %s1052_s20, 128  ;;  %s830_s15 = scalar_lea.hbm %s1107_s7, 256 }
 0x307   : > { %p827_p6 = scmp.ne.s32.totalorder %s1052_s20, %s826_s22  ;;  %p831_p10 = scmp.lt.u32.totalorder %s1052_s20, %s1107_s7 }
 0x308   : > { %p832_p11 = scmp.lt.u32.totalorder %s830_s15, %s826_s22  ;;  %p834_p13 = scmp.lt.u32.totalorder %s826_s22, %s1052_s20 }
 0x309   : > { %p828_p7 = pnand %p827_p6, %p976_p4 }
 0x30a   : > { %p833_p12 = por %p832_p11, %p831_p10 }
 0x30b   : > { %p829_p9 = pneg %p828_p7 }
 0x30c   : > { %p835_p0 = por %p834_p13, %p833_p12 }
 0x30e   : > { %p836_p1 = pnand %p835_p0, %p829_p9 }
 0x310   : > { %839 = shalt.err (!%p836_p1)
}
 0x311   : > { %752 = dma.vmem_to_hbm [thread:$0]  (%p976_p4), %s1054_s17, 128, %s1052_s20, %s548_s21  }
 0x312 PF: > { %p758_p2 = scmp.ge.s32.totalorder %s890_s29, 2  ;;  %s573_s19 = sand.u32 1, %s870_s24  }
 0x313   : > { %s574_s30 = scalar_lea.sflag [#allocation3], %s573_s19 }
 0x314   : > { %p755_p3 = pnand %p758_p2, %p983_p8 }
 0x316   : > { %865 = dma.done.wait (!%p755_p3), %s574_s30, 128  }
 0x317   : > { %867 = vsyncadd (!%p755_p3), %s574_s30, 4294967168  ;;  %s20_s29 = sadd.s32 1, %s890_s29   ;;  %s1110_s24 = smov %s874_s25 }
 0x318   : > { %p17_p5 = scmp.ge.s32.totalorder %s20_s29, 4   ;;  %s1111_s25 = smov %s878_s26 }
 0x319   : > { %s1112_s26 = smov %s989_s14  ;;  %s1113_s27 = smov %s886_s28 }
 0x31a   : > { %s1114_s28 = smov %s1116_s9  ;;  %19 = sbr.rel (!%p17_p5) target bundleno = 4 (0x4), region = 92 }
 0x321   :  { %579 = vsyncpa [#allocation3], 1 }
 0x322   :  { %581 = vsyncpa [#allocation3 + $0x1], 1 }

</bundles_post_ra>
